<compile_context>
chip_gen: v7x
topology: tpu7x:2x2x1
jax: 0.10.0
libtpu: 0.0.40
codegen_flags: <defaults>
</compile_context>

<pallas_src>
import jax
import jax.numpy as jnp
from jax.experimental import pallas as pl
from jax.experimental.pallas import tpu as pltpu


IN_DIM = 9        # input features (fixed by the torch module)
OUT_DIM = 2       # output features (fixed by the torch module)
PAD = 128         # lane width; hidden dims are zero-padded to this
BIAS_ROWS = 8     # sublane-aligned rows for the packed bias slab (>= num layers)


def _round_up(x, m):
    return ((x + m - 1) // m) * m


def _make_kernel(n_deep_layers, param_dtype):
    """Fused MLP kernel. Weights are VMEM-resident; x / out are batch tiles."""

    def kernel(x_ref, w1_ref, ws_ref, bs_ref, o_ref):
        # x_ref : (TB, IN_DIM)               streamed batch tile (f32 or bf16)
        # w1_ref: (IN_DIM, PAD)              param_dtype  layer-0 weight (resident)
        # ws_ref: (n_deep_layers, PAD, PAD)  param_dtype  deeper weights  (resident)
        # bs_ref: (BIAS_ROWS, PAD)           f32   row l = bias of layer l (resident)
        # o_ref : (TB, OUT_DIM)              f32   NARROW output tile
        b = bs_ref[...]                                        # (8, 128) f32
        x = x_ref[...].astype(param_dtype)                     # (TB, 9)

        # Layer 0: real K=9 contraction (no in-kernel feature padding needed).
        h = jnp.dot(x, w1_ref[...], preferred_element_type=jnp.float32)
        h = jnp.maximum(h + b[0:1, :], 0.0)                    # (TB, 128) f32

        # Layers 1..: zero-padded (128,128) weights; padded columns stay exactly 0
        # through bias-add (padded bias = 0) and ReLU, so the chain is exact.
        for l in range(n_deep_layers):                         # static unroll
            h = jnp.dot(h.astype(param_dtype), ws_ref[l],
                        preferred_element_type=jnp.float32)
            h = jnp.maximum(h + b[l + 1:l + 2, :], 0.0)

        # Narrow store: only the 2 real output lanes hit HBM.
        o_ref[...] = h[:, :OUT_DIM]

    return kernel


def pack_params(layers, param_dtype=jnp.float32):
    """Pack an ordered list of (w, b) pairs into 3 padded VMEM-resident slabs.

    layers[l] = (w, b) with w stored (in_features, out_features), i.e. the
    transpose of PyTorch's nn.Linear weight. layers[0] must have in_features=9;
    all deeper layers must have in/out <= 128. Supports 2..8 layers, so the
    torch module's optional fc2/fc3 (hidden_size_2/3 == 0) are handled by just
    omitting them from the list.
    """
    assert 2 <= len(layers) <= BIAS_ROWS
    w1, _ = layers[0]
    assert w1.shape[0] == IN_DIM
    w1_p = jnp.zeros((IN_DIM, PAD), jnp.float32).at[:, : w1.shape[1]].set(w1)

    deep = layers[1:]
    ws_p = jnp.zeros((len(deep), PAD, PAD), jnp.float32)
    for l, (w, _) in enumerate(deep):
        ws_p = ws_p.at[l, : w.shape[0], : w.shape[1]].set(w)

    bs_p = jnp.zeros((BIAS_ROWS, PAD), jnp.float32)
    for l, (_, b) in enumerate(layers):
        bvec = b.reshape(-1)
        bs_p = bs_p.at[l, : bvec.shape[0]].set(bvec)

    # Biases stay f32 (bias-add / ReLU run in f32 even for bf16 weights).
    return w1_p.astype(param_dtype), ws_p.astype(param_dtype), bs_p


def simplenet_forward(x, layers, *, block_b=4096, param_dtype=jnp.float32):
    """x: (B, 9) float32 or bfloat16.  Returns (B, 2) float32.

    block_b: max batch-tile rows. Bigger is better until VMEM; 4096 keeps the
    double-buffered tiles well under a 32 MiB scoped-VMEM budget on every TPU
    generation (v7x included). On v5e/v6e (128 MiB VMEM) it can be raised
    further together with vmem_limit_bytes.
    """
    B = x.shape[0]
    assert x.shape[1] == IN_DIM
    w1_p, ws_p, bs_p = pack_params(layers, param_dtype)
    n_deep = ws_p.shape[0]

    # Sublane alignment: 8 rows for 32-bit inputs, 16 for packed bf16 inputs.
    align = 16 if jnp.dtype(x.dtype).itemsize < 4 else 8
    block_b = _round_up(max(block_b, align), align)

    # Tile so that mid-size batches still produce >= 2 grid steps (lets the
    # "parallel" batch axis span both v7x TensorCores), capped at block_b.
    tb = min(block_b, _round_up(pl.cdiv(B, 2), align))
    grid = (pl.cdiv(B, tb),)   # ragged tail handled by Pallas; no jnp.pad copy

    kernel = _make_kernel(n_deep, param_dtype)

    out = pl.pallas_call(
        kernel,
        out_shape=jax.ShapeDtypeStruct((B, OUT_DIM), jnp.float32),
        grid=grid,
        in_specs=[
            pl.BlockSpec((tb, IN_DIM), lambda i: (i, 0)),           # streamed x tile
            pl.BlockSpec((IN_DIM, PAD), lambda i: (0, 0)),          # resident weight 0
            pl.BlockSpec((n_deep, PAD, PAD), lambda i: (0, 0, 0)),  # resident slab
            pl.BlockSpec((BIAS_ROWS, PAD), lambda i: (0, 0)),       # resident biases
        ],
        out_specs=pl.BlockSpec((tb, OUT_DIM), lambda i: (i, 0)),    # narrow output
        compiler_params=pltpu.CompilerParams(
            dimension_semantics=("parallel",),   # shard batch axis across v7x's 2 TCs
            vmem_limit_bytes=32 * 1024 * 1024,
        ),
    )(x, w1_p, ws_p, bs_p)

    return out


def init_params(key, h1=32, h2=16, h3=8, in_dim=IN_DIM, out_dim=OUT_DIM):
    """Deterministic PyTorch-Linear-style init: U(-1/sqrt(fan_in), 1/sqrt(fan_in))."""

    def linear(k, fan_in, fan_out):
        kw, kb = jax.random.split(k)
        bound = 1.0 / jnp.sqrt(jnp.float32(fan_in))
        w = jax.random.uniform(kw, (fan_in, fan_out), jnp.float32, -bound, bound)
        b = jax.random.uniform(kb, (1, fan_out), jnp.float32, -bound, bound)
        return w, b

    k1, k2, k3, k4 = jax.random.split(key, 4)
    # Ordered (w, b) list: fc1, fc2, fc3, out (drop fc2/fc3 if hidden size is 0).
    return [
        linear(k1, in_dim, h1),
        linear(k2, h1, h2),
        linear(k3, h2, h3),
        linear(k4, h3, out_dim),
    ]


def reference_forward(x, layers):
    # Matches the torch module: ReLU after every Linear, including `out`
    # (the last Linear is wrapped in _fc_block, so its activation is part of
    # the forward pass).
    h = x
    for w, b in layers:
        h = jnp.maximum(h @ w + b, 0.0)
    return h


if __name__ == "__main__":
    key = jax.random.PRNGKey(0)
    kp, kx = jax.random.split(key)

    layers = init_params(kp)                 # 9 -> 32 -> 16 -> 8 -> 2
    B = 200                                  # exercises >=2 grid steps + ragged tail
    x = jax.random.normal(kx, (B, IN_DIM), jnp.float32)
    y_ref = reference_forward(x, layers)

    # f32 path: tb = 104, grid = 2, last block ragged (rows 200..207 masked).
    y = jax.block_until_ready(simplenet_forward(x, layers))
    assert y.shape == (B, OUT_DIM)
    assert jnp.allclose(y, y_ref, atol=1e-4, rtol=1e-4)

    # Tiny-batch path (tb clamps to 8, single grid step, exact block fit).
    x_small = x[:8]
    y_small = jax.block_until_ready(simplenet_forward(x_small, layers))
    assert y_small.shape == (8, OUT_DIM)
    assert jnp.allclose(y_small, y_ref[:8], atol=1e-4, rtol=1e-4)

    # bf16 storage path (v6e/v7x): bf16 x accepted directly, bf16 weights,
    # f32 MXU accumulation + f32 bias/ReLU. Storage-precision change -> loose tol.
    y_bf16 = jax.block_until_ready(
        simplenet_forward(x.astype(jnp.bfloat16), layers,
                          param_dtype=jnp.bfloat16))
    assert y_bf16.shape == (B, OUT_DIM)
    assert bool(jnp.all(jnp.isfinite(y_bf16)))
    assert jnp.allclose(y_bf16, y_ref, atol=1e-1, rtol=1e-1)

    print("KERNEL_OK")
</pallas_src>

<mosaic_0001>
module attributes {stable_mosaic.version = 11 : i64} {
  func.func @kernel(%arg0: i32, %arg1: memref<104x9xf32, #tpu.memory_space<vmem>>, %arg2: memref<9x128xf32, #tpu.memory_space<vmem>>, %arg3: memref<3x128x128xf32, #tpu.memory_space<vmem>>, %arg4: memref<8x128xf32, #tpu.memory_space<vmem>>, %arg5: memref<104x2xf32, #tpu.memory_space<vmem>>) attributes {dimension_semantics = [#tpu.dimension_semantics<parallel>], iteration_bounds = array<i64: 2>, scalar_prefetch = 0 : i64, scratch_operands = 0 : i64, tpu.core_type = #tpu.core_type<tc>, window_params = [{transform_indices = @transform_0, window_bounds = array<i64: 104, 9>}, {pipeline_mode = #tpu.pipeline_mode<synchronous>, transform_indices = @transform_1, window_bounds = array<i64: 9, 128>}, {pipeline_mode = #tpu.pipeline_mode<synchronous>, transform_indices = @transform_2, window_bounds = array<i64: 3, 128, 128>}, {pipeline_mode = #tpu.pipeline_mode<synchronous>, transform_indices = @transform_3, window_bounds = array<i64: 8, 128>}, {transform_indices = @transform_4, window_bounds = array<i64: 104, 2>}]} {
    %c0 = arith.constant 0 : index
    %c0_0 = arith.constant 0 : index
    %0 = vector.load %arg4[%c0, %c0_0] : memref<8x128xf32, #tpu.memory_space<vmem>>, vector<8x128xf32>
    %c0_1 = arith.constant 0 : index
    %c0_2 = arith.constant 0 : index
    %1 = vector.load %arg1[%c0_1, %c0_2] : memref<104x9xf32, #tpu.memory_space<vmem>>, vector<104x9xf32>
    %c0_3 = arith.constant 0 : index
    %c0_4 = arith.constant 0 : index
    %2 = vector.load %arg2[%c0_3, %c0_4] : memref<9x128xf32, #tpu.memory_space<vmem>>, vector<9x128xf32>
    %cst = arith.constant dense<0.000000e+00> : vector<104x128xf32>
    %3 = tpu.matmul %1, %2, %cst {dimension_numbers = #tpu.dot_dimension_numbers<[1], [0], [0], [1], [0, 0, 1, 1], [], []>} : vector<104x9xf32>, vector<9x128xf32>, vector<104x128xf32> -> vector<104x128xf32>
    %4 = vector.extract_strided_slice %0 {offsets = [0, 0], sizes = [1, 128], strides = [1, 1]} : vector<8x128xf32> to vector<1x128xf32>
    %5 = vector.broadcast %4 : vector<1x128xf32> to vector<104x128xf32>
    %6 = arith.addf %3, %5 : vector<104x128xf32>
    %cst_5 = arith.constant 0.000000e+00 : f32
    %7 = vector.broadcast %cst_5 : f32 to vector<104x128xf32>
    %8 = arith.maximumf %6, %7 : vector<104x128xf32>
    %c0_6 = arith.constant 0 : index
    %c0_7 = arith.constant 0 : index
    %c0_8 = arith.constant 0 : index
    %9 = vector.load %arg3[%c0_6, %c0_7, %c0_8] : memref<3x128x128xf32, #tpu.memory_space<vmem>>, vector<1x128x128xf32>
    %10 = vector.shape_cast %9 : vector<1x128x128xf32> to vector<128x128xf32>
    %cst_9 = arith.constant dense<0.000000e+00> : vector<104x128xf32>
    %11 = tpu.matmul %8, %10, %cst_9 {dimension_numbers = #tpu.dot_dimension_numbers<[1], [0], [0], [1], [0, 0, 1, 1], [], []>} : vector<104x128xf32>, vector<128x128xf32>, vector<104x128xf32> -> vector<104x128xf32>
    %12 = vector.extract_strided_slice %0 {offsets = [1, 0], sizes = [1, 128], strides = [1, 1]} : vector<8x128xf32> to vector<1x128xf32>
    %13 = vector.broadcast %12 : vector<1x128xf32> to vector<104x128xf32>
    %14 = arith.addf %11, %13 : vector<104x128xf32>
    %cst_10 = arith.constant 0.000000e+00 : f32
    %15 = vector.broadcast %cst_10 : f32 to vector<104x128xf32>
    %16 = arith.maximumf %14, %15 : vector<104x128xf32>
    %c1 = arith.constant 1 : index
    %c0_11 = arith.constant 0 : index
    %c0_12 = arith.constant 0 : index
    %17 = vector.load %arg3[%c1, %c0_11, %c0_12] : memref<3x128x128xf32, #tpu.memory_space<vmem>>, vector<1x128x128xf32>
    %18 = vector.shape_cast %17 : vector<1x128x128xf32> to vector<128x128xf32>
    %cst_13 = arith.constant dense<0.000000e+00> : vector<104x128xf32>
    %19 = tpu.matmul %16, %18, %cst_13 {dimension_numbers = #tpu.dot_dimension_numbers<[1], [0], [0], [1], [0, 0, 1, 1], [], []>} : vector<104x128xf32>, vector<128x128xf32>, vector<104x128xf32> -> vector<104x128xf32>
    %20 = vector.extract_strided_slice %0 {offsets = [2, 0], sizes = [1, 128], strides = [1, 1]} : vector<8x128xf32> to vector<1x128xf32>
    %21 = vector.broadcast %20 : vector<1x128xf32> to vector<104x128xf32>
    %22 = arith.addf %19, %21 : vector<104x128xf32>
    %cst_14 = arith.constant 0.000000e+00 : f32
    %23 = vector.broadcast %cst_14 : f32 to vector<104x128xf32>
    %24 = arith.maximumf %22, %23 : vector<104x128xf32>
    %c2 = arith.constant 2 : index
    %c0_15 = arith.constant 0 : index
    %c0_16 = arith.constant 0 : index
    %25 = vector.load %arg3[%c2, %c0_15, %c0_16] : memref<3x128x128xf32, #tpu.memory_space<vmem>>, vector<1x128x128xf32>
    %26 = vector.shape_cast %25 : vector<1x128x128xf32> to vector<128x128xf32>
    %cst_17 = arith.constant dense<0.000000e+00> : vector<104x128xf32>
    %27 = tpu.matmul %24, %26, %cst_17 {dimension_numbers = #tpu.dot_dimension_numbers<[1], [0], [0], [1], [0, 0, 1, 1], [], []>} : vector<104x128xf32>, vector<128x128xf32>, vector<104x128xf32> -> vector<104x128xf32>
    %28 = vector.extract_strided_slice %0 {offsets = [3, 0], sizes = [1, 128], strides = [1, 1]} : vector<8x128xf32> to vector<1x128xf32>
    %29 = vector.broadcast %28 : vector<1x128xf32> to vector<104x128xf32>
    %30 = arith.addf %27, %29 : vector<104x128xf32>
    %cst_18 = arith.constant 0.000000e+00 : f32
    %31 = vector.broadcast %cst_18 : f32 to vector<104x128xf32>
    %32 = arith.maximumf %30, %31 : vector<104x128xf32>
    %33 = vector.extract_strided_slice %32 {offsets = [0, 0], sizes = [104, 2], strides = [1, 1]} : vector<104x128xf32> to vector<104x2xf32>
    %c0_19 = arith.constant 0 : index
    %c0_20 = arith.constant 0 : index
    %34 = vector.load %arg5[%c0_19, %c0_20] : memref<104x2xf32, #tpu.memory_space<vmem>>, vector<104x2xf32>
    tpu.vector_store %arg5[%c0_19, %c0_20], %33 {strides = array<i32>} : memref<104x2xf32, #tpu.memory_space<vmem>>, vector<104x2xf32>,
    return
  }
  func.func @transform_0(%arg0: i32) -> (i32, i32) {
    %c0_i32 = arith.constant 0 : i32
    %c0_i32_0 = arith.constant 0 : i32
    return %arg0, %c0_i32 : i32, i32
  }
  func.func @transform_1(%arg0: i32) -> (i32, i32) {
    %c0_i32 = arith.constant 0 : i32
    %c0_i32_0 = arith.constant 0 : i32
    %c0_i32_1 = arith.constant 0 : i32
    return %c0_i32, %c0_i32_0 : i32, i32
  }
  func.func @transform_2(%arg0: i32) -> (i32, i32, i32) {
    %c0_i32 = arith.constant 0 : i32
    %c0_i32_0 = arith.constant 0 : i32
    %c0_i32_1 = arith.constant 0 : i32
    %c0_i32_2 = arith.constant 0 : i32
    return %c0_i32, %c0_i32_0, %c0_i32_1 : i32, i32, i32
  }
  func.func @transform_3(%arg0: i32) -> (i32, i32) {
    %c0_i32 = arith.constant 0 : i32
    %c0_i32_0 = arith.constant 0 : i32
    %c0_i32_1 = arith.constant 0 : i32
    return %c0_i32, %c0_i32_0 : i32, i32
  }
  func.func @transform_4(%arg0: i32) -> (i32, i32) {
    %c0_i32 = arith.constant 0 : i32
    %c0_i32_0 = arith.constant 0 : i32
    return %arg0, %c0_i32 : i32, i32
  }
}

</mosaic_0001>

<bundles_post_ra>
// kernel: tpu_custom_call.1
= control target key start
LH: loop header
LB: loop body
LE: loop exit
PB: predicated region body
PF: predicated region fallthrough
CT: control target
= control target key end

     0   :  { %9 = vsyncpa [#allocation3], 0  ;;  %s1970_s15 = smov 0   ;;  %s1972_s16 = smov 0   ;;  %s2406_s0 = inlined_call_operand.vmem [shape: f32[200,9], index: 0, kind: input, shape index: {}]   ;;  %s2407_s1 = inlined_call_operand.vmem [shape: f32[9,128], index: 1, kind: input, shape index: {}]   ;;  %s2408_s2 = inlined_call_operand.hbm [shape: f32[3,128,128], index: 2, kind: input, shape index: {}]   ;;  %s2409_s3 = inlined_call_operand.vmem [shape: f32[8,128], index: 3, kind: input, shape index: {}]   ;;  %s2410_s4 = inlined_call_operand.vmem [shape: f32[200,2], index: 4, kind: output, shape index: {}]  }
   0x1   :  { %s1974_s17 = smov 0  }
   0x2 LB: > { %s1983_s18 = sadd.s32 4294967295, %s1904_s17   ;;  %s1985_s19 = sadd.s32 1, %s1904_s17   ;;  %s1904_s17 = sphi %s1974_s17, %s2425_s17   ;;  %s1900_s16 = sphi %s1972_s16, %s2424_s16   ;;  %s1896_s15 = sphi %s1970_s15, %s2423_s15  }
   0x3   : > { %s108_s20 = ssub.s32 %s1904_s17, %s1985_s19  ;;  %s111_s21 = sadd.s32 1, %s1900_s16 }
   0x4   : > { %p109_p0 = scmp.eq.s32.totalorder %s108_s20, 0  ;;  %p121_p1 = scmp.ne.s32.totalorder %s1900_s16, %s1896_s15 }
   0x5   : > { %p122_p2 = scmp.eq.s32.totalorder %s1983_s18, 1  ;;  %p1224_p3 = scmp.ge.s32.totalorder %s1904_s17, 1 }
   0x6   : > { %s1993_s22 = scalar_select %p109_p0, %s1900_s16, %s111_s21  }
   0x7   : > { %p1995_p4 = por %p122_p2, %p121_p1  ;;  %p135_p5 = scmp.lt.s32.totalorder %s1904_s17, 3 }
   0x8   : > { %p2411_p6 = scmp.eq.s32.totalorder %s1983_s18, 0  ;;  %s1938_s25 = smov [#allocation2]  }
   0x9   : > { %s2413_s23 = scalar_select %p1995_p4, 1, 0 }
   0xa   : > { %p2000_p7 = pnand %p1224_p3, %p135_p5  ;;  %s150_s26 = sshll.u32 %s1938_s25, 4  ;;  %s151_s26 = int_to_ptr.vmem [resolvable:$true] %s150_s26 }
   0xb   : > { %s1818_s30 = scalar_lea.hbm %s2408_s2, 6144 }
   0xc   : > { %s2414_s24 = scalar_select %p2000_p7, 1, 0 }
   0xd   : > { %p1712_p8 = pneg %p2000_p7  ;;  %p1819_p10 = scmp.ne.s32.totalorder %s2408_s2, %s1818_s30 }
   0xe   : > { %p1825_p0 = scmp.lt.u32.totalorder %s1818_s30, %s2408_s2 }
   0xf   : > { %p2008_p9 = pnand %p2411_p6, %p1712_p8 }
  0x11   : > { %p1820_p11 = pneg %p2008_p9 }
  0x13   : > { %p1821_p12 = pnand %p1820_p11, %p1819_p10 }
  0x15   : > { %p1822_p13 = pneg %p1821_p12 }
  0x17   : > { %p1827_p1 = pnand %p1825_p0, %p1822_p13 }
  0x19   : > { %1830 = shalt.err (!%p1827_p1)
}
  0x1a   : > { %s1831_s9 = scalar_lea.vmem %s151_s26, 6144  ;;  %p1839_p8 = scmp.lt.s32.totalorder %s151_s26, %s151_s26 }
  0x1b   : > { %p1832_p2 = scmp.ne.s32.totalorder %s151_s26, %s1831_s9  ;;  %p1840_p6 = scmp.lt.s32.totalorder %s1831_s9, %s1831_s9 }
  0x1d   : > { %p1834_p3 = pnand %p1832_p2, %p1820_p11  ;;  %p1841_p4 = por %p1840_p6, %p1839_p8 }
  0x1f   : > { %p1835_p5 = pneg %p1834_p3 }
  0x21   : > { %p1842_p7 = pnand %p1841_p4, %p1835_p5 }
  0x23   : > { %1845 = shalt.err (!%p1842_p7)
}
  0x24   : > { %s1939_s10 = smov 128   ;;  %s1940_s11 = smov 8  }
  0x25   : > { %1715 = dma.hbm_to_vmem [thread:$0]  (!%p2008_p9), %s2408_s2, 6144, %s151_s26, [#allocation3], %s1939_s10, %s1939_s10, %s1940_s11  }
  0x26   : > { %p2416_p10 = scmp.ne.s32.totalorder %s2414_s24, 0 }
  0x27   : > { %p2417_p12 = scmp.eq.s32.totalorder (!%p2416_p10), %s1983_s18, 0 }
  0x28   : > { %186 = sbr.rel (%p2416_p10) target bundleno = 1031 (0x407), region = 36 }
  0x2f   : > { %1891 = dma.done.wait (%p2417_p12), [#allocation3], 6144   ;;  %p2418_p11 = pmov %p2417_p12 }
  0x30   : > { %v1941_v0 = vmov 0.0|0.0   ;;  %s2036_s14 = smul.u32 13, %s1983_s18  ;;  %vm1942_vm0 = vmmov 0   ;;  %v1943_v1 = vmov 0.0   ;;  %vm294_vm1 = vcmask 1040384   ;;  %v248_v2 = vld [vmem:[%s2407_s1] sm:$0xff] }
  0x31   : > { %1893 = vsyncadd (%p2418_p11), [#allocation3], 4294961152  ;;  %1615 = vmatprep.subr.bf16.mxu0 %v1941_v0  ;;  %1619 = vmatprep.subr.bf16.mxu1 %v1941_v0  ;;  %vm1944_vm2 = vmmov 1   ;;  %v249_v3 = vld [vmem:[%s2407_s1 + $0x8] sm:$0x1]  ;;  %v441_v4 = vld [vmem:[#allocation2] sm:$0xff] }
  0x32   : > { %1363 = vmatprep.mubr.msk.f32.mxu0 %vm1942_vm0, %v1943_v1  ;;  %1434 = vmatprep.mubr.msk.f32.mxu1 %vm1942_vm0, %v1943_v1  ;;  %p220_p4 = scmp.lt.s32.totalorder %s2036_s14, 24  ;;  %vm1617_vm3 = vmpackc.low %vm294_vm1, %vm1944_vm2  ;;  %v1616_v5 = vpack.c.bf16 %v249_v3, %v248_v2  ;;  %v442_v6 = vld [vmem:[#allocation2 + $0x8] sm:$0xff]  ;;  %v443_v7 = vld [vmem:[#allocation2 + $0x10] sm:$0xff]  ;;  %vm254_vm4 = vcmask 72704   ;;  %s212_s6 = sand.u32 1, %s1896_s15   ;;  %vm932_vm5 = vcmask 15360  }
  0x33   : > { %v444_v8 = vld [vmem:[#allocation2 + $0x18] sm:$0xff]  ;;  %v1620_v9 = vpack.c.bf16 %v442_v6, %v441_v4  ;;  %v445_v12 = vld [vmem:[#allocation2 + $0x20] sm:$0xff]  ;;  %v446_v13 = vld [vmem:[#allocation2 + $0x28] sm:$0xff]  ;;  %v250_v4 = vlaneseq  ;;  %s1707_s7 = smul.u32 104, %s212_s6  ;;  %p2419_p6 = scmp.ne.s32.totalorder %s2413_s23, 0 }
  0x34   : > { %s221_s17 = scalar_select %p220_p4, %s2036_s14, 24  ;;  %1618 = vmatpush3.bf16.msk.msra.mxu0 %vm1617_vm3, %v1616_v5  ;;  %v1623_v11 = vpack.c.bf16 %v444_v8, %v443_v7  ;;  %v1626_v15 = vpack.c.bf16 %v446_v13, %v445_v12  ;;  %v447_v16 = vld [vmem:[#allocation2 + $0x30] sm:$0xff]  ;;  %v448_v17 = vld [vmem:[#allocation2 + $0x38] sm:$0xff]  ;;  %v449_v20 = vld [vmem:[#allocation2 + $0x40] sm:$0xff] }
  0x35   : > { %1621 = vmatpush3.bf16.msra.mxu1 %v1620_v9  ;;  %1643 = vmatprep.subr.bf16.mxu0 %v1941_v0  ;;  %v1629_v19 = vpack.c.bf16 %v448_v17, %v447_v16  ;;  %v450_v21 = vld [vmem:[#allocation2 + $0x48] sm:$0xff]  ;;  %v451_v24 = vld [vmem:[#allocation2 + $0x50] sm:$0xff]  ;;  %v452_v25 = vld [vmem:[#allocation2 + $0x58] sm:$0xff]  ;;  %v2125_v5 = vshrl.u32 %v250_v4, 7  ;;  %s2277_s8 = scalar_lea.vmem [#allocation4], %s1707_s7   ;;  %s954_s15 = ssub.s32 (%p2419_p6), 25, %s2036_s14 }
  0x36   : > { %s1229_s26 = sshll.u32 %s221_s17, 3  ;;  %1622 = vmatprep.subr.bf16.mxu1 %v1941_v0  ;;  %v1632_v23 = vpack.c.bf16 %v450_v21, %v449_v20  ;;  %v1635_v27 = vpack.c.bf16 %v452_v25, %v451_v24  ;;  %v453_v28 = vld [vmem:[#allocation2 + $0x60] sm:$0xff]  ;;  %v454_v29 = vld [vmem:[#allocation2 + $0x68] sm:$0xff]  ;;  %v455_v39 = vld [vmem:[#allocation2 + $0x70] sm:$0xff]  ;;  %s1256_s9 = smul.u32 (%p2419_p6), 104, %s1983_s18 }
  0x37   : > { %s2054_s29 = scalar_lea.vmem %s2406_s0, %s1229_s26  ;;  %v1638_v31 = vpack.c.bf16 %v454_v29, %v453_v28  ;;  %v456_v40 = vld [vmem:[#allocation2 + $0x78] sm:$0xff]  ;;  %v605_v42 = vld [vmem:[#allocation2 + $0x80] sm:$0xff]  ;;  %v606_v43 = vld [vmem:[#allocation2 + $0x88] sm:$0xff]  ;;  %v252_v6 = vsub.s32 0, %v2125_v5  ;;  %p955_p7 = scmp.lt.s32.totalorder (%p2419_p6), %s954_s15, 13 }
  0x38   : > { %v235_v10 = vld [vmem:[%s2054_s29] sm:$0xff]  ;;  %v236_v14 = vld [vmem:[%s2054_s29 + $0x8] sm:$0xff]  ;;  %v237_v18 = vld [vmem:[%s2054_s29 + $0x10] sm:$0xff]  ;;  %v1641_v41 = vpack.c.bf16 %v456_v40, %v455_v39  ;;  %v1644_v45 = vpack.c.bf16 %v606_v43, %v605_v42  ;;  %s2324_s12 = scalar_lea.vmem (%p2419_p6), %s2410_s4, %s1256_s9  }
  0x39   : > { %1364 = vmatmul.mubr.msk.f32.vlgmr.msra.gmra.mrb[0].mxu0 %vm254_vm4, %v235_v10  ;;  %1624 = vmatpush3.bf16.msra.mxu1 %v1623_v11  ;;  %v238_v22 = vld [vmem:[%s2054_s29 + $0x18] sm:$0xff]  ;;  %v239_v26 = vld [vmem:[%s2054_s29 + $0x20] sm:$0xff]  ;;  %v240_v30 = vld [vmem:[%s2054_s29 + $0x28] sm:$0xff] }
  0x3a   : > { %1366 = vmatprep.mubr.msk.f32.mxu0 %vm1942_vm0, %v1943_v1  ;;  %1625 = vmatprep.subr.bf16.mxu1 %v1941_v0  ;;  %v241_v32 = vld [vmem:[%s2054_s29 + $0x30] sm:$0xff]  ;;  %v242_v33 = vld [vmem:[%s2054_s29 + $0x38] sm:$0xff]  ;;  %v243_v34 = vld [vmem:[%s2054_s29 + $0x40] sm:$0xff] }
  0x3b   : > { %v244_v35 = vld [vmem:[%s2054_s29 + $0x48] sm:$0xff]  ;;  %v245_v36 = vld [vmem:[%s2054_s29 + $0x50] sm:$0xff]  ;;  %v246_v37 = vld [vmem:[%s2054_s29 + $0x58] sm:$0xff]  ;;  %1645 = vmatpush3.bf16.msra.mxu0 %v1644_v45 }
  0x3c   : > { %v247_v38 = vld [vmem:[%s2054_s29 + $0x60] sm:$0xff]  ;;  %v607_v44 = vld [vmem:[#allocation2 + $0x90] sm:$0xff]  ;;  %v608_v46 = vld [vmem:[#allocation2 + $0x98] sm:$0xff]  ;;  %1646 = vmatprep.subr.bf16.mxu0 %v1941_v0 }
  0x3d   : > { %1367 = vmatmul.mubr.msk.f32.gmra.mrb[2].mxu0 %vm254_vm4, %v236_v14  ;;  %1627 = vmatpush3.bf16.msra.mxu1 %v1626_v15  ;;  %v1647_v47 = vpack.c.bf16 %v608_v46, %v607_v44  ;;  %v609_v48 = vld [vmem:[#allocation2 + $0xa0] sm:$0xff]  ;;  %v610_v49 = vld [vmem:[#allocation2 + $0xa8] sm:$0xff]  ;;  %v611_v51 = vld [vmem:[#allocation2 + $0xb0] sm:$0xff] }
  0x3e   : > { %1369 = vmatprep.mubr.msk.f32.mxu0 %vm1942_vm0, %v1943_v1  ;;  %1628 = vmatprep.subr.bf16.mxu1 %v1941_v0  ;;  %v1650_v50 = vpack.c.bf16 %v610_v49, %v609_v48  ;;  %v612_v52 = vld [vmem:[#allocation2 + $0xb8] sm:$0xff]  ;;  %v613_v54 = vld [vmem:[#allocation2 + $0xc0] sm:$0xff]  ;;  %v614_v55 = vld [vmem:[#allocation2 + $0xc8] sm:$0xff] }
  0x3f   : > { %1648 = vmatpush3.bf16.msra.mxu0 %v1647_v47  ;;  %v1653_v53 = vpack.c.bf16 %v612_v52, %v611_v51  ;;  %v1656_v56 = vpack.c.bf16 %v614_v55, %v613_v54  ;;  %v615_v57 = vld [vmem:[#allocation2 + $0xd0] sm:$0xff]  ;;  %v616_v58 = vld [vmem:[#allocation2 + $0xd8] sm:$0xff]  ;;  %v617_v60 = vld [vmem:[#allocation2 + $0xe0] sm:$0xff] }
  0x40   : > { %1649 = vmatprep.subr.bf16.mxu0 %v1941_v0  ;;  %v1659_v59 = vpack.c.bf16 %v616_v58, %v615_v57  ;;  %v618_v61 = vld [vmem:[#allocation2 + $0xe8] sm:$0xff]  ;;  %v619_v63 = vld [vmem:[#allocation2 + $0xf0] sm:$0xff]  ;;  %v620_v2 = vld [vmem:[#allocation2 + $0xf8] sm:$0xff] }
  0x41   : > { %1370 = vmatmul.mubr.msk.f32.gmra.mrb[4].mxu0 %vm254_vm4, %v237_v18  ;;  %1630 = vmatpush3.bf16.msra.mxu1 %v1629_v19  ;;  %v1662_v62 = vpack.c.bf16 %v618_v61, %v617_v60  ;;  %v1665_v3 = vpack.c.bf16 %v620_v2, %v619_v63  ;;  %v2131_v7 = vld [vmem:[%s2409_s3] sm:$0xff]  ;;  %v771_v2 = vld [vmem:[#allocation2 + $0x110] sm:$0xff] }
  0x42   : > { %1372 = vmatprep.mubr.msk.f32.mxu0 %vm1942_vm0, %v1943_v1  ;;  %1631 = vmatprep.subr.bf16.mxu1 %v1941_v0  ;;  %v2134_v8 = vrot.slane %v2131_v7, %v252_v6  ;;  %v769_v61 = vld [vmem:[#allocation2 + $0x100] sm:$0xff] }
  0x43   : > { %1651 = vmatpush3.bf16.msra.mxu0 %v1650_v50  ;;  %v773_v6 = vld [vmem:[#allocation2 + $0x120] sm:$0xff] }
  0x44   : > { %1652 = vmatprep.subr.bf16.mxu0 %v1941_v0 }
  0x45   : > { %1373 = vmatmul.mubr.msk.f32.gmra.mrb[6].mxu0 %vm254_vm4, %v238_v22  ;;  %1633 = vmatpush3.bf16.msra.mxu1 %v1632_v23 }
  0x46   : > { %1375 = vmatprep.mubr.msk.f32.mxu0 %vm1942_vm0, %v1943_v1  ;;  %1634 = vmatprep.subr.bf16.mxu1 %v1941_v0 }
  0x47   : > { %1654 = vmatpush3.bf16.msra.mxu0 %v1653_v53 }
  0x48   : > { %1655 = vmatprep.subr.bf16.mxu0 %v1941_v0 }
  0x49   : > { %1376 = vmatmul.mubr.msk.f32.gmra.mrb[8].mxu0 %vm254_vm4, %v239_v26  ;;  %1636 = vmatpush3.bf16.msra.mxu1 %v1635_v27 }
  0x4a   : > { %1378 = vmatprep.mubr.msk.f32.mxu0 %vm1942_vm0, %v1943_v1  ;;  %1637 = vmatprep.subr.bf16.mxu1 %v1941_v0 }
  0x4b   : > { %1657 = vmatpush3.bf16.msra.mxu0 %v1656_v56 }
  0x4c   : > { %1658 = vmatprep.subr.bf16.mxu0 %v1941_v0 }
  0x4d   : > { %1379 = vmatmul.mubr.msk.f32.gmra.mrb[10].mxu0 %vm254_vm4, %v240_v30  ;;  %1639 = vmatpush3.bf16.msra.mxu1 %v1638_v31 }
  0x4e   : > { %1381 = vmatprep.mubr.msk.f32.mxu0 %vm1942_vm0, %v1943_v1  ;;  %1640 = vmatprep.subr.bf16.mxu1 %v1941_v0 }
  0x4f   : > { %1660 = vmatpush3.bf16.msra.mxu0 %v1659_v59 }
  0x50   : > { %1661 = vmatprep.subr.bf16.mxu0 %v1941_v0 }
  0x51   : > { %1382 = vmatmul.mubr.msk.f32.gmra.mrb[12].mxu0 %vm254_vm4, %v241_v32  ;;  %1642 = vmatpush3.bf16.msra.mxu1 %v1641_v41 }
  0x52   : > { %1384 = vmatprep.mubr.msk.f32.mxu0 %vm1942_vm0, %v1943_v1  ;;  %1691 = vmatprep.subr.bf16.mxu1 %v1941_v0 }
  0x53   : > { %1663 = vmatpush3.bf16.msra.mxu0 %v1662_v62  ;;  %v770_v62 = vld [vmem:[#allocation2 + $0x108] sm:$0xff] }
  0x54   : > { %1664 = vmatprep.subr.bf16.mxu0 %v1941_v0  ;;  %v1668_v63 = vpack.c.bf16 %v770_v62, %v769_v61 }
  0x55   : > { %1385 = vmatmul.mubr.msk.f32.gmra.mrb[14].mxu0 %vm254_vm4, %v242_v33 }
  0x56   : > { %1387 = vmatprep.mubr.msk.f32.mxu0 %vm1942_vm0, %v1943_v1 }
  0x57   : > { %1666 = vmatpush3.bf16.msra.mxu0 %v1665_v3  ;;  %v772_v3 = vld [vmem:[#allocation2 + $0x118] sm:$0xff] }
  0x58   : > { %1667 = vmatprep.subr.bf16.mxu0 %v1941_v0  ;;  %v1671_v4 = vpack.c.bf16 %v772_v3, %v771_v2 }
  0x59   : > { %1388 = vmatmul.mubr.msk.f32.gmra.mrb[16].mxu0 %vm254_vm4, %v243_v34 }
  0x5a   : > { %1390 = vmatprep.mubr.msk.f32.mxu0 %vm1942_vm0, %v1943_v1 }
  0x5d   : > { %1391 = vmatmul.mubr.msk.f32.gmra.mrb[18].mxu0 %vm254_vm4, %v244_v35 }
  0x5e   : > { %1393 = vmatprep.mubr.msk.f32.mxu0 %vm1942_vm0, %v1943_v1 }
  0x61   : > { %1394 = vmatmul.mubr.msk.f32.gmra.mrb[20].mxu0 %vm254_vm4, %v245_v36 }
  0x62   : > { %1396 = vmatprep.mubr.msk.f32.mxu0 %vm1942_vm0, %v1943_v1 }
  0x65   : > { %1397 = vmatmul.mubr.msk.f32.gmra.mrb[22].mxu0 %vm254_vm4, %v246_v37 }
  0x66   : > { %1399 = vmatprep.mubr.msk.f32.mxu0 %vm1942_vm0, %v1943_v1 }
  0x69   : > { %1400 = vmatmul.mubr.msk.f32.gmra.mrb[24].mxu0 %vm254_vm4, %v247_v38 }
  0x6a   : > { %1505 = vmatprep.mubr.msk.f32.mxu0 %vm1942_vm0, %v1943_v1 }
 0x10c   : > { %v364_v9 = vpop.f32.mrb[0].mxu0 }
 0x10d   : > { %v365_v10 = vadd.f32 %v364_v9, %v2134_v8  ;;  %v1365_v11 = vpop.f32.mrb[1].mxu0 }
 0x10e   : > { %v776_v11 = vld [vmem:[#allocation2 + $0x138] sm:$0xff] }
 0x10f   : > { %v428_v12 = vmax.f32 %v365_v10, 0.0  ;;  %v775_v10 = vld [vmem:[#allocation2 + $0x130] sm:$0xff] }
 0x110   : > { %v369_v13 = vpop.f32.mrb[2].mxu0 }
 0x111   : > { %v370_v14 = vadd.f32 %v369_v13, %v2134_v8  ;;  %v1368_v15 = vpop.f32.mrb[3].mxu0  ;;  %1435 = vmatmul.mubr.f32.vlgmr.msra.gmra.mrb[0].mxu1 %v428_v12  ;;  %v1677_v12 = vpack.c.bf16 %v776_v11, %v775_v10  ;;  %v777_v13 = vld [vmem:[#allocation2 + $0x140] sm:$0xff] }
 0x112   : > { %1437 = vmatprep.mubr.msk.f32.mxu1 %vm1942_vm0, %v1943_v1  ;;  %1699 = vmatpush3.bf16.msra.mxu1 %v1668_v63 }
 0x113   : > { %v429_v16 = vmax.f32 %v370_v14, 0.0  ;;  %1692 = vmatprep.subr.bf16.mxu1 %v1941_v0  ;;  %v778_v14 = vld [vmem:[#allocation2 + $0x148] sm:$0xff] }
 0x114   : > { %v374_v17 = vpop.f32.mrb[4].mxu0  ;;  %v1680_v15 = vpack.c.bf16 %v778_v14, %v777_v13 }
 0x115   : > { %v375_v18 = vadd.f32 %v374_v17, %v2134_v8  ;;  %v1371_v19 = vpop.f32.mrb[5].mxu0  ;;  %1438 = vmatmul.mubr.f32.gmra.mrb[2].mxu1 %v429_v16  ;;  %v779_v16 = vld [vmem:[#allocation2 + $0x150] sm:$0xff]  ;;  %v780_v17 = vld [vmem:[#allocation2 + $0x158] sm:$0xff] }
 0x116   : > { %1440 = vmatprep.mubr.msk.f32.mxu1 %vm1942_vm0, %v1943_v1  ;;  %1700 = vmatpush3.bf16.msra.mxu1 %v1671_v4  ;;  %v781_v19 = vld [vmem:[#allocation2 + $0x160] sm:$0xff] }
 0x117   : > { %v430_v20 = vmax.f32 %v375_v18, 0.0  ;;  %1693 = vmatprep.subr.bf16.mxu1 %v1941_v0  ;;  %v1683_v18 = vpack.c.bf16 %v780_v17, %v779_v16  ;;  %v784_v16 = vld [vmem:[#allocation2 + $0x178] sm:$0xff] }
 0x118   : > { %v379_v21 = vpop.f32.mrb[6].mxu0 }
 0x119   : > { %v380_v22 = vadd.f32 %v379_v21, %v2134_v8  ;;  %v1374_v23 = vpop.f32.mrb[7].mxu0  ;;  %1441 = vmatmul.mubr.f32.gmra.mrb[4].mxu1 %v430_v20  ;;  %v782_v20 = vld [vmem:[#allocation2 + $0x168] sm:$0xff] }
 0x11a   : > { %1443 = vmatprep.mubr.msk.f32.mxu1 %vm1942_vm0, %v1943_v1  ;;  %v1686_v21 = vpack.c.bf16 %v782_v20, %v781_v19 }
 0x11b   : > { %v431_v24 = vmax.f32 %v380_v22, 0.0  ;;  %v459_v22 = vsub.s32 1, %v2125_v5 }
 0x11c   : > { %v384_v25 = vpop.f32.mrb[8].mxu0 }
 0x11d   : > { %v385_v26 = vadd.f32 %v384_v25, %v2134_v8  ;;  %v1377_v27 = vpop.f32.mrb[9].mxu0  ;;  %1444 = vmatmul.mubr.f32.gmra.mrb[6].mxu1 %v431_v24  ;;  %v2184_v23 = vrot.slane %v2131_v7, %v459_v22 }
 0x11e   : > { %1446 = vmatprep.mubr.msk.f32.mxu1 %vm1942_vm0, %v1943_v1 }
 0x11f   : > { %v432_v28 = vmax.f32 %v385_v26, 0.0 }
 0x120   : > { %v389_v29 = vpop.f32.mrb[10].mxu0 }
 0x121   : > { %v390_v30 = vadd.f32 %v389_v29, %v2134_v8  ;;  %v1380_v31 = vpop.f32.mrb[11].mxu0  ;;  %1447 = vmatmul.mubr.f32.gmra.mrb[8].mxu1 %v432_v28 }
 0x122   : > { %1449 = vmatprep.mubr.msk.f32.mxu1 %vm1942_vm0, %v1943_v1 }
 0x123   : > { %v433_v32 = vmax.f32 %v390_v30, 0.0 }
 0x124   : > { %v394_v33 = vpop.f32.mrb[12].mxu0 }
 0x125   : > { %v395_v34 = vadd.f32 %v394_v33, %v2134_v8  ;;  %v1383_v35 = vpop.f32.mrb[13].mxu0  ;;  %1450 = vmatmul.mubr.f32.gmra.mrb[10].mxu1 %v433_v32 }
 0x126   : > { %1452 = vmatprep.mubr.msk.f32.mxu1 %vm1942_vm0, %v1943_v1 }
 0x127   : > { %v434_v36 = vmax.f32 %v395_v34, 0.0 }
 0x128   : > { %v399_v37 = vpop.f32.mrb[14].mxu0 }
 0x129   : > { %v400_v38 = vadd.f32 %v399_v37, %v2134_v8  ;;  %v1386_v39 = vpop.f32.mrb[15].mxu0  ;;  %1453 = vmatmul.mubr.f32.gmra.mrb[12].mxu1 %v434_v36 }
 0x12a   : > { %1455 = vmatprep.mubr.msk.f32.mxu1 %vm1942_vm0, %v1943_v1 }
 0x12b   : > { %v435_v40 = vmax.f32 %v400_v38, 0.0 }
 0x12c   : > { %v404_v41 = vpop.f32.mrb[16].mxu0 }
 0x12d   : > { %v405_v42 = vadd.f32 %v404_v41, %v2134_v8  ;;  %v1389_v43 = vpop.f32.mrb[17].mxu0  ;;  %1456 = vmatmul.mubr.f32.gmra.mrb[14].mxu1 %v435_v40 }
 0x12e   : > { %1458 = vmatprep.mubr.msk.f32.mxu1 %vm1942_vm0, %v1943_v1 }
 0x12f   : > { %v436_v44 = vmax.f32 %v405_v42, 0.0 }
 0x130   : > { %v409_v45 = vpop.f32.mrb[18].mxu0 }
 0x131   : > { %v410_v46 = vadd.f32 %v409_v45, %v2134_v8  ;;  %v1392_v47 = vpop.f32.mrb[19].mxu0  ;;  %1459 = vmatmul.mubr.f32.gmra.mrb[16].mxu1 %v436_v44 }
 0x132   : > { %1461 = vmatprep.mubr.msk.f32.mxu1 %vm1942_vm0, %v1943_v1 }
 0x133   : > { %v437_v48 = vmax.f32 %v410_v46, 0.0 }
 0x134   : > { %v414_v49 = vpop.f32.mrb[20].mxu0 }
 0x135   : > { %v415_v50 = vadd.f32 %v414_v49, %v2134_v8  ;;  %v1395_v51 = vpop.f32.mrb[21].mxu0  ;;  %1462 = vmatmul.mubr.f32.gmra.mrb[18].mxu1 %v437_v48 }
 0x136   : > { %1464 = vmatprep.mubr.msk.f32.mxu1 %vm1942_vm0, %v1943_v1 }
 0x137   : > { %v438_v52 = vmax.f32 %v415_v50, 0.0 }
 0x138   : > { %v419_v53 = vpop.f32.mrb[22].mxu0 }
 0x139   : > { %v420_v54 = vadd.f32 %v419_v53, %v2134_v8  ;;  %v1398_v55 = vpop.f32.mrb[23].mxu0  ;;  %1465 = vmatmul.mubr.f32.gmra.mrb[20].mxu1 %v438_v52 }
 0x13a   : > { %1467 = vmatprep.mubr.msk.f32.mxu1 %vm1942_vm0, %v1943_v1 }
 0x13b   : > { %v439_v56 = vmax.f32 %v420_v54, 0.0 }
 0x13c   : > { %v424_v57 = vpop.f32.mrb[24].mxu0 }
 0x13d   : > { %v425_v58 = vadd.f32 %v424_v57, %v2134_v8  ;;  %v1401_v59 = vpop.f32.mrb[25].mxu0  ;;  %1468 = vmatmul.mubr.f32.gmra.mrb[22].mxu1 %v439_v56  ;;  %v774_v8 = vld [vmem:[#allocation2 + $0x128] sm:$0xff] }
 0x13e   : > { %1470 = vmatprep.mubr.msk.f32.mxu1 %vm1942_vm0, %v1943_v1  ;;  %v1674_v9 = vpack.c.bf16 %v774_v8, %v773_v6 }
 0x13f   : > { %v440_v60 = vmax.f32 %v425_v58, 0.0 }
 0x140   : > { %1701 = vmatpush3.bf16.msra.mxu1 %v1674_v9 }
 0x141   : > { %1471 = vmatmul.mubr.f32.gmra.mrb[24].mxu1 %v440_v60  ;;  %1694 = vmatprep.subr.bf16.mxu1 %v1941_v0 }
 0x142   : > { %1585 = vmatprep.mubr.msk.f32.mxu1 %vm1942_vm0, %v1943_v1 }
 0x144   : > { %1702 = vmatpush3.bf16.msra.mxu1 %v1677_v12 }
 0x145   : > { %1695 = vmatprep.subr.bf16.mxu1 %v1941_v0 }
 0x148   : > { %1703 = vmatpush3.bf16.msra.mxu1 %v1680_v15 }
 0x149   : > { %1696 = vmatprep.subr.bf16.mxu1 %v1941_v0 }
 0x14c   : > { %1704 = vmatpush3.bf16.msra.mxu1 %v1683_v18 }
 0x14d   : > { %1697 = vmatprep.subr.bf16.mxu1 %v1941_v0 }
 0x150   : > { %1705 = vmatpush3.bf16.msra.mxu1 %v1686_v21 }
 0x151   : > { %1698 = vmatprep.subr.bf16.mxu1 %v1941_v0 }
 0x1e4   : > { %v527_v24 = vpop.f32.mrb[0].mxu1 }
 0x1e5   : > { %v528_v25 = vadd.f32 %v527_v24, %v2184_v23  ;;  %v1436_v26 = vpop.f32.mrb[1].mxu1 }
 0x1e7   : > { %v591_v27 = vmax.f32 %v528_v25, 0.0 }
 0x1e8   : > { %v532_v28 = vpop.f32.mrb[2].mxu1 }
 0x1e9   : > { %v533_v29 = vadd.f32 %v532_v28, %v2184_v23  ;;  %v1439_v30 = vpop.f32.mrb[3].mxu1  ;;  %1506 = vmatmul.mubr.f32.vlgmr.msra.gmra.mrb[26].mxu0 %v591_v27 }
 0x1ea   : > { %1508 = vmatprep.mubr.msk.f32.mxu0 %vm1942_vm0, %v1943_v1  ;;  %1669 = vmatpush3.bf16.msra.mxu0 %v1668_v63 }
 0x1eb   : > { %v592_v31 = vmax.f32 %v533_v29, 0.0  ;;  %1670 = vmatprep.subr.bf16.mxu0 %v1941_v0 }
 0x1ec   : > { %v537_v32 = vpop.f32.mrb[4].mxu1 }
 0x1ed   : > { %v538_v33 = vadd.f32 %v537_v32, %v2184_v23  ;;  %v1442_v34 = vpop.f32.mrb[5].mxu1  ;;  %1509 = vmatmul.mubr.f32.gmra.mrb[28].mxu0 %v592_v31 }
 0x1ee   : > { %1511 = vmatprep.mubr.msk.f32.mxu0 %vm1942_vm0, %v1943_v1  ;;  %1672 = vmatpush3.bf16.msra.mxu0 %v1671_v4 }
 0x1ef   : > { %v593_v35 = vmax.f32 %v538_v33, 0.0  ;;  %1673 = vmatprep.subr.bf16.mxu0 %v1941_v0 }
 0x1f0   : > { %v542_v36 = vpop.f32.mrb[6].mxu1 }
 0x1f1   : > { %v543_v37 = vadd.f32 %v542_v36, %v2184_v23  ;;  %v1445_v38 = vpop.f32.mrb[7].mxu1  ;;  %1512 = vmatmul.mubr.f32.gmra.mrb[30].mxu0 %v593_v35 }
 0x1f2   : > { %1514 = vmatprep.mubr.msk.f32.mxu0 %vm1942_vm0, %v1943_v1  ;;  %1675 = vmatpush3.bf16.msra.mxu0 %v1674_v9 }
 0x1f3   : > { %v594_v39 = vmax.f32 %v543_v37, 0.0  ;;  %1676 = vmatprep.subr.bf16.mxu0 %v1941_v0 }
 0x1f4   : > { %v547_v40 = vpop.f32.mrb[8].mxu1 }
 0x1f5   : > { %v548_v41 = vadd.f32 %v547_v40, %v2184_v23  ;;  %v1448_v42 = vpop.f32.mrb[9].mxu1  ;;  %1515 = vmatmul.mubr.f32.gmra.mrb[32].mxu0 %v594_v39 }
 0x1f6   : > { %1517 = vmatprep.mubr.msk.f32.mxu0 %vm1942_vm0, %v1943_v1  ;;  %1678 = vmatpush3.bf16.msra.mxu0 %v1677_v12 }
 0x1f7   : > { %v595_v43 = vmax.f32 %v548_v41, 0.0  ;;  %1679 = vmatprep.subr.bf16.mxu0 %v1941_v0 }
 0x1f8   : > { %v552_v44 = vpop.f32.mrb[10].mxu1 }
 0x1f9   : > { %v553_v45 = vadd.f32 %v552_v44, %v2184_v23  ;;  %v1451_v46 = vpop.f32.mrb[11].mxu1  ;;  %1518 = vmatmul.mubr.f32.gmra.mrb[34].mxu0 %v595_v43 }
 0x1fa   : > { %1520 = vmatprep.mubr.msk.f32.mxu0 %vm1942_vm0, %v1943_v1  ;;  %1681 = vmatpush3.bf16.msra.mxu0 %v1680_v15  ;;  %v783_v15 = vld [vmem:[#allocation2 + $0x170] sm:$0xff] }
 0x1fb   : > { %v596_v47 = vmax.f32 %v553_v45, 0.0  ;;  %1682 = vmatprep.subr.bf16.mxu0 %v1941_v0  ;;  %v1689_v17 = vpack.c.bf16 %v784_v16, %v783_v15 }
 0x1fc   : > { %v557_v48 = vpop.f32.mrb[12].mxu1 }
 0x1fd   : > { %v558_v49 = vadd.f32 %v557_v48, %v2184_v23  ;;  %v1454_v50 = vpop.f32.mrb[13].mxu1  ;;  %1521 = vmatmul.mubr.f32.gmra.mrb[36].mxu0 %v596_v47  ;;  %1706 = vmatpush3.bf16.msra.mxu1 %v1689_v17 }
 0x1fe   : > { %1523 = vmatprep.mubr.msk.f32.mxu0 %vm1942_vm0, %v1943_v1  ;;  %1684 = vmatpush3.bf16.msra.mxu0 %v1683_v18  ;;  %v623_v18 = vsub.s32 2, %v2125_v5 }
 0x1ff   : > { %v597_v51 = vmax.f32 %v558_v49, 0.0  ;;  %1685 = vmatprep.subr.bf16.mxu0 %v1941_v0 }
 0x200   : > { %v562_v52 = vpop.f32.mrb[14].mxu1  ;;  %v2234_v19 = vrot.slane %v2131_v7, %v623_v18 }
 0x201   : > { %v563_v53 = vadd.f32 %v562_v52, %v2184_v23  ;;  %v1457_v54 = vpop.f32.mrb[15].mxu1  ;;  %1524 = vmatmul.mubr.f32.gmra.mrb[38].mxu0 %v597_v51 }
 0x202   : > { %1526 = vmatprep.mubr.msk.f32.mxu0 %vm1942_vm0, %v1943_v1  ;;  %1687 = vmatpush3.bf16.msra.mxu0 %v1686_v21 }
 0x203   : > { %v598_v55 = vmax.f32 %v563_v53, 0.0  ;;  %1688 = vmatprep.subr.bf16.mxu0 %v1941_v0 }
 0x204   : > { %v567_v56 = vpop.f32.mrb[16].mxu1 }
 0x205   : > { %v568_v57 = vadd.f32 %v567_v56, %v2184_v23  ;;  %v1460_v58 = vpop.f32.mrb[17].mxu1  ;;  %1527 = vmatmul.mubr.f32.gmra.mrb[40].mxu0 %v598_v55 }
 0x206   : > { %1529 = vmatprep.mubr.msk.f32.mxu0 %vm1942_vm0, %v1943_v1  ;;  %1690 = vmatpush3.bf16.msra.mxu0 %v1689_v17 }
 0x207   : > { %v599_v59 = vmax.f32 %v568_v57, 0.0 }
 0x208   : > { %v572_v60 = vpop.f32.mrb[18].mxu1 }
 0x209   : > { %v573_v61 = vadd.f32 %v572_v60, %v2184_v23  ;;  %v1463_v62 = vpop.f32.mrb[19].mxu1  ;;  %1530 = vmatmul.mubr.f32.gmra.mrb[42].mxu0 %v599_v59 }
 0x20a   : > { %1532 = vmatprep.mubr.msk.f32.mxu0 %vm1942_vm0, %v1943_v1 }
 0x20b   : > { %v600_v63 = vmax.f32 %v573_v61, 0.0 }
 0x20c   : > { %v577_v2 = vpop.f32.mrb[20].mxu1 }
 0x20d   : > { %v578_v0 = vadd.f32 %v577_v2, %v2184_v23  ;;  %v1466_v3 = vpop.f32.mrb[21].mxu1  ;;  %1533 = vmatmul.mubr.f32.gmra.mrb[44].mxu0 %v600_v63 }
 0x20e   : > { %1535 = vmatprep.mubr.msk.f32.mxu0 %vm1942_vm0, %v1943_v1 }
 0x20f   : > { %v601_v4 = vmax.f32 %v578_v0, 0.0 }
 0x210   : > { %v582_v6 = vpop.f32.mrb[22].mxu1 }
 0x211   : > { %v583_v8 = vadd.f32 %v582_v6, %v2184_v23  ;;  %v1469_v9 = vpop.f32.mrb[23].mxu1  ;;  %1536 = vmatmul.mubr.f32.gmra.mrb[46].mxu0 %v601_v4 }
 0x212   : > { %1538 = vmatprep.mubr.msk.f32.mxu0 %vm1942_vm0, %v1943_v1 }
 0x213   : > { %v602_v10 = vmax.f32 %v583_v8, 0.0 }
 0x214   : > { %v587_v11 = vpop.f32.mrb[24].mxu1 }
 0x215   : > { %v588_v12 = vadd.f32 %v587_v11, %v2184_v23  ;;  %v1472_v13 = vpop.f32.mrb[25].mxu1  ;;  %1539 = vmatmul.mubr.f32.gmra.mrb[48].mxu0 %v602_v10  ;;  %v787_v11 = vsub.s32 3, %v2125_v5 }
 0x216   : > { %1541 = vmatprep.mubr.msk.f32.mxu0 %vm1942_vm0, %v1943_v1 }
 0x217   : > { %v603_v14 = vmax.f32 %v588_v12, 0.0  ;;  %v2274_v12 = vrot.slane %v2131_v7, %v787_v11 }
 0x219   : > { %1542 = vmatmul.mubr.f32.gmra.mrb[50].mxu0 %v603_v14 }
 0x21a   : > { %1576 = vmatprep.mubr.msk.f32.mxu0 %vm1942_vm0, %v1943_v1 }
 0x2bc   : > { %v691_v20 = vpop.f32.mrb[26].mxu0 }
 0x2bd   : > { %v692_v21 = vadd.f32 %v691_v20, %v2234_v19  ;;  %v1507_v22 = vpop.f32.mrb[27].mxu0 }
 0x2bf   : > { %v755_v23 = vmax.f32 %v692_v21, 0.0 }
 0x2c0   : > { %v696_v24 = vpop.f32.mrb[28].mxu0 }
 0x2c1   : > { %v697_v25 = vadd.f32 %v696_v24, %v2234_v19  ;;  %v1510_v26 = vpop.f32.mrb[29].mxu0  ;;  %1577 = vmatmul.mubr.f32.vlgmr.msra.gmra.mrb[52].mxu0 %v755_v23 }
 0x2c2   : > { %1579 = vmatprep.mubr.msk.f32.mxu0 %vm1942_vm0, %v1943_v1 }
 0x2c3   : > { %v756_v27 = vmax.f32 %v697_v25, 0.0 }
 0x2c4   : > { %v701_v28 = vpop.f32.mrb[30].mxu0 }
 0x2c5   : > { %v702_v29 = vadd.f32 %v701_v28, %v2234_v19  ;;  %v1513_v30 = vpop.f32.mrb[31].mxu0  ;;  %1580 = vmatmul.mubr.f32.gmra.mrb[54].mxu0 %v756_v27 }
 0x2c6   : > { %1582 = vmatprep.mubr.msk.f32.mxu0 %vm1942_vm0, %v1943_v1 }
 0x2c7   : > { %v757_v31 = vmax.f32 %v702_v29, 0.0 }
 0x2c8   : > { %v706_v32 = vpop.f32.mrb[32].mxu0 }
 0x2c9   : > { %v707_v33 = vadd.f32 %v706_v32, %v2234_v19  ;;  %v1516_v34 = vpop.f32.mrb[33].mxu0  ;;  %1583 = vmatmul.mubr.f32.gmra.mrb[56].mxu0 %v757_v31 }
 0x2cb   : > { %v758_v35 = vmax.f32 %v707_v33, 0.0 }
 0x2cc   : > { %v711_v36 = vpop.f32.mrb[34].mxu0 }
 0x2cd   : > { %v712_v37 = vadd.f32 %v711_v36, %v2234_v19  ;;  %v1519_v38 = vpop.f32.mrb[35].mxu0  ;;  %1586 = vmatmul.mubr.f32.vlgmr.msra.gmra.mrb[26].mxu1 %v758_v35 }
 0x2ce   : > { %1588 = vmatprep.mubr.msk.f32.mxu1 %vm1942_vm0, %v1943_v1 }
 0x2cf   : > { %v759_v39 = vmax.f32 %v712_v37, 0.0 }
 0x2d0   : > { %v716_v40 = vpop.f32.mrb[36].mxu0 }
 0x2d1   : > { %v717_v41 = vadd.f32 %v716_v40, %v2234_v19  ;;  %v1522_v42 = vpop.f32.mrb[37].mxu0  ;;  %1589 = vmatmul.mubr.f32.gmra.mrb[28].mxu1 %v759_v39 }
 0x2d2   : > { %1591 = vmatprep.mubr.msk.f32.mxu1 %vm1942_vm0, %v1943_v1 }
 0x2d3   : > { %v760_v43 = vmax.f32 %v717_v41, 0.0 }
 0x2d4   : > { %v721_v44 = vpop.f32.mrb[38].mxu0 }
 0x2d5   : > { %v722_v45 = vadd.f32 %v721_v44, %v2234_v19  ;;  %v1525_v46 = vpop.f32.mrb[39].mxu0  ;;  %1592 = vmatmul.mubr.f32.gmra.mrb[30].mxu1 %v760_v43 }
 0x2d6   : > { %1594 = vmatprep.mubr.msk.f32.mxu1 %vm1942_vm0, %v1943_v1 }
 0x2d7   : > { %v761_v47 = vmax.f32 %v722_v45, 0.0 }
 0x2d8   : > { %v726_v48 = vpop.f32.mrb[40].mxu0 }
 0x2d9   : > { %v727_v49 = vadd.f32 %v726_v48, %v2234_v19  ;;  %v1528_v50 = vpop.f32.mrb[41].mxu0  ;;  %1595 = vmatmul.mubr.f32.gmra.mrb[32].mxu1 %v761_v47 }
 0x2da   : > { %1597 = vmatprep.mubr.msk.f32.mxu1 %vm1942_vm0, %v1943_v1 }
 0x2db   : > { %v762_v51 = vmax.f32 %v727_v49, 0.0 }
 0x2dc   : > { %v731_v52 = vpop.f32.mrb[42].mxu0 }
 0x2dd   : > { %v732_v53 = vadd.f32 %v731_v52, %v2234_v19  ;;  %v1531_v54 = vpop.f32.mrb[43].mxu0  ;;  %1598 = vmatmul.mubr.f32.gmra.mrb[34].mxu1 %v762_v51 }
 0x2de   : > { %1600 = vmatprep.mubr.msk.f32.mxu1 %vm1942_vm0, %v1943_v1 }
 0x2df   : > { %v763_v55 = vmax.f32 %v732_v53, 0.0 }
 0x2e0   : > { %v736_v56 = vpop.f32.mrb[44].mxu0 }
 0x2e1   : > { %v737_v57 = vadd.f32 %v736_v56, %v2234_v19  ;;  %v1534_v58 = vpop.f32.mrb[45].mxu0  ;;  %1601 = vmatmul.mubr.f32.gmra.mrb[36].mxu1 %v763_v55 }
 0x2e2   : > { %1603 = vmatprep.mubr.msk.f32.mxu1 %vm1942_vm0, %v1943_v1 }
 0x2e3   : > { %v764_v59 = vmax.f32 %v737_v57, 0.0 }
 0x2e4   : > { %v741_v60 = vpop.f32.mrb[46].mxu0 }
 0x2e5   : > { %v742_v61 = vadd.f32 %v741_v60, %v2234_v19  ;;  %v1537_v62 = vpop.f32.mrb[47].mxu0  ;;  %1604 = vmatmul.mubr.f32.gmra.mrb[38].mxu1 %v764_v59 }
 0x2e6   : > { %1606 = vmatprep.mubr.msk.f32.mxu1 %vm1942_vm0, %v1943_v1 }
 0x2e7   : > { %v765_v63 = vmax.f32 %v742_v61, 0.0 }
 0x2e8   : > { %v746_v2 = vpop.f32.mrb[48].mxu0 }
 0x2e9   : > { %v747_v0 = vadd.f32 %v746_v2, %v2234_v19  ;;  %v1540_v3 = vpop.f32.mrb[49].mxu0  ;;  %1607 = vmatmul.mubr.f32.gmra.mrb[40].mxu1 %v765_v63 }
 0x2ea   : > { %1609 = vmatprep.mubr.msk.f32.mxu1 %vm1942_vm0, %v1943_v1 }
 0x2eb   : > { %v766_v4 = vmax.f32 %v747_v0, 0.0 }
 0x2ec   : > { %v751_v6 = vpop.f32.mrb[50].mxu0 }
 0x2ed   : > { %v752_v8 = vadd.f32 %v751_v6, %v2234_v19  ;;  %v1543_v9 = vpop.f32.mrb[51].mxu0  ;;  %1610 = vmatmul.mubr.f32.gmra.mrb[42].mxu1 %v766_v4 }
 0x2ee   : > { %1612 = vmatprep.mubr.msk.f32.mxu1 %vm1942_vm0, %v1943_v1 }
 0x2ef   : > { %v767_v10 = vmax.f32 %v752_v8, 0.0 }
 0x2f1   : > { %1613 = vmatmul.mubr.f32.gmra.mrb[44].mxu1 %v767_v10 }
 0x394   : > { %v855_v13 = vpop.f32.mrb[52].mxu0 }
 0x395   : > { %v856_v14 = vadd.f32 %v855_v13, %v2274_v12  ;;  %v1578_v15 = vpop.f32.mrb[53].mxu0 }
 0x397   : > { %v919_v16 = vmax.f32 %v856_v14, 0.0 }
 0x398   : > { %v860_v17 = vpop.f32.mrb[54].mxu0 }
 0x399   : > { %933 = vst.msk [vmem:[%s2277_s8] sm:$0xff] %vm932_vm5, %v919_v16  ;;  %v861_v1 = vadd.f32 %v860_v17, %v2274_v12  ;;  %v1581_v5 = vpop.f32.mrb[55].mxu0 }
 0x39b   : > { %v920_v7 = vmax.f32 %v861_v1, 0.0 }
 0x39c   : > { %v865_v18 = vpop.f32.mrb[56].mxu0 }
 0x39d   : > { %934 = vst.msk [vmem:[%s2277_s8 + $0x8] sm:$0xff] %vm932_vm5, %v920_v7  ;;  %v866_v19 = vadd.f32 %v865_v18, %v2274_v12  ;;  %v1584_v20 = vpop.f32.mrb[57].mxu0 }
 0x39f   : > { %v921_v21 = vmax.f32 %v866_v19, 0.0 }
 0x3a0   : > { %v870_v22 = vpop.f32.mrb[26].mxu1 }
 0x3a1   : > { %935 = vst.msk [vmem:[%s2277_s8 + $0x10] sm:$0xff] %vm932_vm5, %v921_v21  ;;  %v871_v23 = vadd.f32 %v870_v22, %v2274_v12  ;;  %v1587_v24 = vpop.f32.mrb[27].mxu1 }
 0x3a3   : > { %v922_v25 = vmax.f32 %v871_v23, 0.0 }
 0x3a4   : > { %v875_v26 = vpop.f32.mrb[28].mxu1 }
 0x3a5   : > { %936 = vst.msk [vmem:[%s2277_s8 + $0x18] sm:$0xff] %vm932_vm5, %v922_v25  ;;  %v876_v27 = vadd.f32 %v875_v26, %v2274_v12  ;;  %v1590_v28 = vpop.f32.mrb[29].mxu1 }
 0x3a7   : > { %v923_v29 = vmax.f32 %v876_v27, 0.0 }
 0x3a8   : > { %v880_v30 = vpop.f32.mrb[30].mxu1 }
 0x3a9   : > { %937 = vst.msk [vmem:[%s2277_s8 + $0x20] sm:$0xff] %vm932_vm5, %v923_v29  ;;  %v881_v31 = vadd.f32 %v880_v30, %v2274_v12  ;;  %v1593_v32 = vpop.f32.mrb[31].mxu1 }
 0x3ab   : > { %v924_v33 = vmax.f32 %v881_v31, 0.0 }
 0x3ac   : > { %v885_v34 = vpop.f32.mrb[32].mxu1 }
 0x3ad   : > { %938 = vst.msk [vmem:[%s2277_s8 + $0x28] sm:$0xff] %vm932_vm5, %v924_v33  ;;  %v886_v35 = vadd.f32 %v885_v34, %v2274_v12  ;;  %v1596_v36 = vpop.f32.mrb[33].mxu1 }
 0x3af   : > { %v925_v37 = vmax.f32 %v886_v35, 0.0 }
 0x3b0   : > { %v890_v38 = vpop.f32.mrb[34].mxu1 }
 0x3b1   : > { %939 = vst.msk [vmem:[%s2277_s8 + $0x30] sm:$0xff] %vm932_vm5, %v925_v37  ;;  %v891_v39 = vadd.f32 %v890_v38, %v2274_v12  ;;  %v1599_v40 = vpop.f32.mrb[35].mxu1 }
 0x3b3   : > { %v926_v41 = vmax.f32 %v891_v39, 0.0 }
 0x3b4   : > { %v895_v42 = vpop.f32.mrb[36].mxu1 }
 0x3b5   : > { %940 = vst.msk [vmem:[%s2277_s8 + $0x38] sm:$0xff] %vm932_vm5, %v926_v41  ;;  %v896_v43 = vadd.f32 %v895_v42, %v2274_v12  ;;  %v1602_v44 = vpop.f32.mrb[37].mxu1 }
 0x3b7   : > { %v927_v45 = vmax.f32 %v896_v43, 0.0 }
 0x3b8   : > { %v900_v46 = vpop.f32.mrb[38].mxu1 }
 0x3b9   : > { %941 = vst.msk [vmem:[%s2277_s8 + $0x40] sm:$0xff] %vm932_vm5, %v927_v45  ;;  %v901_v47 = vadd.f32 %v900_v46, %v2274_v12  ;;  %v1605_v48 = vpop.f32.mrb[39].mxu1 }
 0x3bb   : > { %v928_v49 = vmax.f32 %v901_v47, 0.0 }
 0x3bc   : > { %v905_v50 = vpop.f32.mrb[40].mxu1 }
 0x3bd   : > { %942 = vst.msk [vmem:[%s2277_s8 + $0x48] sm:$0xff] %vm932_vm5, %v928_v49  ;;  %v906_v51 = vadd.f32 %v905_v50, %v2274_v12  ;;  %v1608_v52 = vpop.f32.mrb[41].mxu1 }
 0x3bf   : > { %v929_v53 = vmax.f32 %v906_v51, 0.0 }
 0x3c0   : > { %v910_v54 = vpop.f32.mrb[42].mxu1 }
 0x3c1   : > { %943 = vst.msk [vmem:[%s2277_s8 + $0x50] sm:$0xff] %vm932_vm5, %v929_v53  ;;  %v911_v55 = vadd.f32 %v910_v54, %v2274_v12  ;;  %v1611_v56 = vpop.f32.mrb[43].mxu1 }
 0x3c3   : > { %v930_v57 = vmax.f32 %v911_v55, 0.0  ;;  %952 = sbr.rel (!%p2419_p6) target bundleno = 1031 (0x407), region = 44 }
 0x3c4   : > { %v915_v58 = vpop.f32.mrb[44].mxu1 }
 0x3c5   : > { %944 = vst.msk [vmem:[%s2277_s8 + $0x58] sm:$0xff] %vm932_vm5, %v930_v57  ;;  %v916_v59 = vadd.f32 %v915_v58, %v2274_v12  ;;  %v1614_v60 = vpop.f32.mrb[45].mxu1 }
 0x3c7   : > { %v931_v61 = vmax.f32 %v916_v59, 0.0 }
 0x3c9   : > { %945 = vst.msk [vmem:[%s2277_s8 + $0x60] sm:$0xff] %vm932_vm5, %v931_v61 }
 0x3ca   : > { %s2427_s15 = smov (!%p955_p7, %s954_s15), 13 }
 0x3cb   : > { %s1244_s13 = sshll.u32 %s2427_s15, 7 }
 0x3cc   : > { %p1247_p9 = scmp.eq.s32.totalorder %s1244_s13, 0 }
 0x3cd   : > { %1814 = sdivrem.u32 (!%p1247_p9), %s2427_s15, 13 }
 0x3ce   : > { %963 = sbr.rel (%p1247_p9) target bundleno = 1031 (0x407), region = 48 }
 0x3d6   : > { %s2330_s23 = spop.drf %1814 }
 0x3d7   : > { %p1248_p13 = scmp.le.s32.totalorder %s2330_s23, 0 }
 0x3d8   : > { %s2420_s18 = smov (!%p1248_p13), %s2324_s12  ;;  %s2421_s14 = smov (!%p1248_p13), %s2277_s8 }
 0x3d9   : > { %1170 = sbr.rel (%p1248_p13) target bundleno = 1002 (0x3ea), region = 127  ;;  %s2339_s17 = smov (!%p1248_p13), 0  }
 0x3da   : > { %s2341_s20 = smov (!%p1248_p13), 0  }
 0x3e0 LB: >> { %v1051_v62 = vld [vmem:[%s1912_s14] sm:$0xff]  ;;  %v1053_v63 = vld [vmem:[%s1912_s14 + $0x8] sm:$0xff]  ;;  %v1055_v2 = vld [vmem:[%s1912_s14 + $0x10] sm:$0xff]  ;;  %s1077_s21 = sadd.s32 1, %s1916_s17  ;;  %s1045_s20 = sadd.s32 1, %s1920_s20   ;;  %s1920_s20 = sphi %s2341_s20, %s1045_s20   ;;  %s1916_s17 = sphi %s2339_s17, %s2422_s17   ;;  %s1912_s14 = sphi %s2421_s14, %s1082_s14   ;;  %s1908_s18 = sphi %s2420_s18, %s1083_s18  }
 0x3e1   : >> { %1052 = vst [vmem:[%s1908_s18] sm:$0xff] %v1051_v62  ;;  %1054 = vst [vmem:[%s1908_s18 + $0x8] sm:$0xff] %v1053_v63  ;;  %v1057_v0 = vld [vmem:[%s1912_s14 + $0x18] sm:$0xff]  ;;  %v1059_v3 = vld [vmem:[%s1912_s14 + $0x20] sm:$0xff]  ;;  %p1078_p0 = scmp.ge.s32.totalorder %s1077_s21, %s2330_s23  ;;  %p1044_p1 = scmp.ge.s32.totalorder %s1045_s20, %s2330_s23 }
 0x3e2   : >> { %1056 = vst [vmem:[%s1908_s18 + $0x10] sm:$0xff] %v1055_v2  ;;  %v1061_v4 = vld [vmem:[%s1912_s14 + $0x28] sm:$0xff]  ;;  %1058 = vst [vmem:[%s1908_s18 + $0x18] sm:$0xff] %v1057_v0  ;;  %v1063_v6 = vld [vmem:[%s1912_s14 + $0x30] sm:$0xff] }
 0x3e3   : >> { %1060 = vst [vmem:[%s1908_s18 + $0x20] sm:$0xff] %v1059_v3  ;;  %1062 = vst [vmem:[%s1908_s18 + $0x28] sm:$0xff] %v1061_v4  ;;  %v1065_v8 = vld [vmem:[%s1912_s14 + $0x38] sm:$0xff]  ;;  %v1067_v9 = vld [vmem:[%s1912_s14 + $0x40] sm:$0xff]  ;;  %s2429_s21 = smov (%p1078_p0, %s1077_s21), 0  ;;  %1047 = sbr.rel (!%p1044_p1) target bundleno = 992 (0x3e0), region = 133 }
 0x3e4   : >> { %1064 = vst [vmem:[%s1908_s18 + $0x30] sm:$0xff] %v1063_v6  ;;  %1066 = vst [vmem:[%s1908_s18 + $0x38] sm:$0xff] %v1065_v8  ;;  %v1069_v10 = vld [vmem:[%s1912_s14 + $0x48] sm:$0xff]  ;;  %v1071_v11 = vld [vmem:[%s1912_s14 + $0x50] sm:$0xff]  ;;  %s1080_s24 = smul.u32 104, %s2429_s21  ;;  %s2422_s17 = smov %s2429_s21 }
 0x3e5   : >> { %1068 = vst [vmem:[%s1908_s18 + $0x40] sm:$0xff] %v1067_v9  ;;  %v1073_v12 = vld [vmem:[%s1912_s14 + $0x58] sm:$0xff]  ;;  %1070 = vst [vmem:[%s1908_s18 + $0x48] sm:$0xff] %v1069_v10  ;;  %v1075_v13 = vld [vmem:[%s1912_s14 + $0x60] sm:$0xff] }
 0x3e6   : >> { %1072 = vst [vmem:[%s1908_s18 + $0x50] sm:$0xff] %v1071_v11  ;;  %1074 = vst [vmem:[%s1908_s18 + $0x58] sm:$0xff] %v1073_v12  ;;  %s1082_s14 = scalar_lea.vmem %s2277_s8, %s1080_s24 [#allocation4]  }
 0x3e7   : >> { %1076 = vst [vmem:[%s1908_s18 + $0x60] sm:$0xff] %v1075_v13  ;;  %s1083_s18 = scalar_lea.vmem %s2324_s12, %s1080_s24  }
 0x3ea PF: > { %1816 = sdivrem.u32 %s2427_s15, 13 }
 0x3eb   : > { %s1249_s25 = smul.u32 104, %s2330_s23 }
 0x3ed   : > { %s1088_s26 = scalar_lea.vmem %s2277_s8, %s1249_s25 [#allocation4]   ;;  %s1090_s27 = scalar_lea.vmem %s2324_s12, %s1249_s25  }
 0x3f3   : > { %s1817_s28 = spop.drf %1816 }
 0x3f4   : > { %p1251_p2 = scmp.le.s32.totalorder %s1817_s28, 0 }
 0x3f5   : > { %s1922_s29 = smov (!%p1251_p2), %s1090_s27   ;;  %s1926_s30 = smov (!%p1251_p2), %s1088_s26  }
 0x3f6   : > { %1184 = sbr.rel (%p1251_p2) target bundleno = 1031 (0x407), region = 138  ;;  %s1930_s5 = smov (!%p1251_p2), 0  }
 0x3f7   : > { %s1934_s6 = smov (!%p1251_p2), 0  }
 0x3fd LB: >> { %v1100_v14 = vld [vmem:[%s1928_s30] sm:$0xff]  ;;  %s1102_s7 = sadd.s32 1, %s1932_s5  ;;  %s1094_s6 = sadd.s32 1, %s1936_s6   ;;  %s1936_s6 = sphi %s1934_s6, %s1094_s6   ;;  %s1932_s5 = sphi %s1930_s5, %s1931_s5   ;;  %s1928_s30 = sphi %s1926_s30, %s1107_s30   ;;  %s1924_s29 = sphi %s1922_s29, %s1108_s29  }
 0x3fe   : >> { %1101 = vst [vmem:[%s1924_s29] sm:$0xff] %v1100_v14  ;;  %p1103_p3 = scmp.ge.s32.totalorder %s1102_s7, %s1817_s28  ;;  %p1093_p5 = scmp.ge.s32.totalorder %s1094_s6, %s1817_s28 }
 0x400   : >> { %s2431_s7 = smov (%p1103_p3, %s1102_s7), 0  ;;  %1096 = sbr.rel (!%p1093_p5) target bundleno = 1021 (0x3fd), region = 144 }
 0x401   : >> { %s1252_s8 = sshll.u32 %s2431_s7, 3  ;;  %s1931_s5 = smov %s2431_s7  }
 0x402   : >> { %s1107_s30 = scalar_lea.vmem %s1088_s26, %s1252_s8 [#allocation4]   ;;  %s1108_s29 = scalar_lea.vmem %s1090_s27, %s1252_s8  }
 0x407 PF: > { %p12_p8 = scmp.ge.s32.totalorder %s1985_s19, 4   ;;  %s2423_s15 = smov %s1900_s16 }
 0x408   : > { %s2424_s16 = smov %s1993_s22  ;;  %s2425_s17 = smov %s1985_s19 }
 0x409   :  { %14 = sbr.rel (!%p12_p8) target bundleno = 2 (0x2), region = 155 }
 0x410   :  { %1124 = vsyncpa [#allocation3], 1 }
 0x411   :  { %1126 = vsyncpa [#allocation3 + $0x1], 1 }

</bundles_post_ra>
